<compile_context>
chip_gen: v6e
topology: v6e:2x2x1
jax: 0.10.0
libtpu: 0.0.40
codegen_flags: <defaults>
</compile_context>

<pallas_src>
import jax
import jax.numpy as jnp
from jax.experimental import pallas as pl
from jax.experimental.pallas import tpu as pltpu


def linear_kernel(w_ref, b_ref, xt_ref, o_ref):
    # w_ref: SMEM (3,) scalars, b_ref: SMEM (1,) scalar
    # xt_ref: VMEM (3, TN) feature-major block, o_ref: VMEM (1, TN) lane-dense
    acc = (xt_ref[0:1, :] * w_ref[0]
           + xt_ref[1:2, :] * w_ref[1]
           + xt_ref[2:3, :] * w_ref[2]
           + b_ref[0])
    o_ref[...] = acc.astype(o_ref.dtype)


def multivariable_regression(x, weight, bias, *, block_n=8192):
    """Forward pass of nn.Linear(3, 1): out = x @ weight.T + bias.

    x:      (N, 3)
    weight: (1, 3)   (PyTorch nn.Linear convention)
    bias:   (1,)
    returns (N, 1)
    """
    n, f = x.shape
    assert f == 3, "kernel is specialized to 3 input features"
    out_f = weight.shape[0]
    assert out_f == 1

    # Layout plumbing (plain JAX): batch on lanes, params flattened for SMEM.
    xt = x.T                                  # (3, N) feature-major
    w_flat = weight.reshape(-1)               # (3,)
    b_flat = bias.reshape(-1)                 # (1,)

    # Lane-dense block over the batch axis.
    if n <= block_n:
        bn = n                                # block == full array dims (always legal)
    else:
        bn = block_n                          # multiple of 128 -> unmasked wide stores

    n_pad = pl.cdiv(n, bn) * bn
    if n_pad != n:
        xt = jnp.pad(xt, ((0, 0), (0, n_pad - n)))

    grid = (n_pad // bn,)

    out = pl.pallas_call(
        linear_kernel,
        out_shape=jax.ShapeDtypeStruct((out_f, n_pad), x.dtype),
        grid=grid,
        in_specs=[
            pl.BlockSpec(memory_space=pltpu.MemorySpace.SMEM),   # weight scalars
            pl.BlockSpec(memory_space=pltpu.MemorySpace.SMEM),   # bias scalar
            pl.BlockSpec((f, bn), lambda i: (0, i)),             # x block (3, bn)
        ],
        out_specs=pl.BlockSpec((out_f, bn), lambda i: (0, i)),   # out block (1, bn)
        compiler_params=pltpu.CompilerParams(
            dimension_semantics=("parallel",)),
    )(w_flat, b_flat, xt)

    # Back to nn.Linear output layout (N, 1).
    return out[:, :n].T


if __name__ == "__main__":
    key = jax.random.PRNGKey(0)
    kx, kw, kb, kx2 = jax.random.split(key, 4)

    # Deterministic parameter init mimicking nn.Linear default: U(-1/sqrt(3), 1/sqrt(3)).
    bound = 1.0 / jnp.sqrt(3.0)
    weight = jax.random.uniform(kw, (1, 3), minval=-bound, maxval=bound, dtype=jnp.float32)
    bias = jax.random.uniform(kb, (1,), minval=-bound, maxval=bound, dtype=jnp.float32)

    # Small toy batch (matches nn.Linear(3, 1) usage): 8 samples x 3 features.
    x = jax.random.normal(kx, (8, 3), dtype=jnp.float32)
    out = jax.block_until_ready(multivariable_regression(x, weight, bias))
    ref = x @ weight.T + bias
    assert out.shape == (8, 1)
    assert jnp.allclose(out, ref, atol=1e-5), "mismatch vs reference (small batch)"

    # Larger ragged batch to exercise the lane-dense gridded + padded path.
    x2 = jax.random.normal(kx2, (3000, 3), dtype=jnp.float32)
    out2 = jax.block_until_ready(
        multivariable_regression(x2, weight, bias, block_n=2048))
    ref2 = x2 @ weight.T + bias
    assert out2.shape == (3000, 1)
    assert jnp.allclose(out2, ref2, atol=1e-5), "mismatch vs reference (large batch)"

    print("KERNEL_OK")
</pallas_src>

<mosaic_0001>
module attributes {stable_mosaic.version = 11 : i64} {
  func.func @linear_kernel(%arg0: i32, %arg1: memref<3xf32, #tpu.memory_space<smem>>, %arg2: memref<1xf32, #tpu.memory_space<smem>>, %arg3: memref<3x8xf32, #tpu.memory_space<vmem>>, %arg4: memref<1x8xf32, #tpu.memory_space<vmem>>) attributes {dimension_semantics = [#tpu.dimension_semantics<parallel>], iteration_bounds = array<i64: 1>, scalar_prefetch = 0 : i64, scratch_operands = 0 : i64, tpu.core_type = #tpu.core_type<tc>, window_params = [{transform_indices = @transform_0, window_bounds = array<i64: 3>}, {transform_indices = @transform_1, window_bounds = array<i64: 1>}, {transform_indices = @transform_2, window_bounds = array<i64: 3, 8>}, {transform_indices = @transform_3, window_bounds = array<i64: 1, 8>}]} {
    %c0 = arith.constant 0 : index
    %c0_0 = arith.constant 0 : index
    %0 = vector.load %arg3[%c0, %c0_0] : memref<3x8xf32, #tpu.memory_space<vmem>>, vector<1x8xf32>
    %c0_1 = arith.constant 0 : index
    %1 = memref.load %arg1[%c0_1] : memref<3xf32, #tpu.memory_space<smem>>
    %2 = vector.broadcast %1 : f32 to vector<1x8xf32>
    %3 = arith.mulf %0, %2 : vector<1x8xf32>
    %c1 = arith.constant 1 : index
    %c0_2 = arith.constant 0 : index
    %4 = vector.load %arg3[%c1, %c0_2] : memref<3x8xf32, #tpu.memory_space<vmem>>, vector<1x8xf32>
    %c1_3 = arith.constant 1 : index
    %5 = memref.load %arg1[%c1_3] : memref<3xf32, #tpu.memory_space<smem>>
    %6 = vector.broadcast %5 : f32 to vector<1x8xf32>
    %7 = arith.mulf %4, %6 : vector<1x8xf32>
    %8 = arith.addf %3, %7 : vector<1x8xf32>
    %c2 = arith.constant 2 : index
    %c0_4 = arith.constant 0 : index
    %9 = vector.load %arg3[%c2, %c0_4] : memref<3x8xf32, #tpu.memory_space<vmem>>, vector<1x8xf32>
    %c2_5 = arith.constant 2 : index
    %10 = memref.load %arg1[%c2_5] : memref<3xf32, #tpu.memory_space<smem>>
    %11 = vector.broadcast %10 : f32 to vector<1x8xf32>
    %12 = arith.mulf %9, %11 : vector<1x8xf32>
    %13 = arith.addf %8, %12 : vector<1x8xf32>
    %c0_6 = arith.constant 0 : index
    %14 = memref.load %arg2[%c0_6] : memref<1xf32, #tpu.memory_space<smem>>
    %15 = vector.broadcast %14 : f32 to vector<1x8xf32>
    %16 = arith.addf %13, %15 : vector<1x8xf32>
    %c0_7 = arith.constant 0 : index
    %c0_8 = arith.constant 0 : index
    %17 = vector.load %arg4[%c0_7, %c0_8] : memref<1x8xf32, #tpu.memory_space<vmem>>, vector<1x8xf32>
    tpu.vector_store %arg4[%c0_7, %c0_8], %16 {strides = array<i32>} : memref<1x8xf32, #tpu.memory_space<vmem>>, vector<1x8xf32>,
    return
  }
  func.func @transform_0(%arg0: i32) -> i32 {
    %c0_i32 = arith.constant 0 : i32
    %c0_i32_0 = arith.constant 0 : i32
    return %c0_i32 : i32
  }
  func.func @transform_1(%arg0: i32) -> i32 {
    %c0_i32 = arith.constant 0 : i32
    %c0_i32_0 = arith.constant 0 : i32
    return %c0_i32 : i32
  }
  func.func @transform_2(%arg0: i32) -> (i32, i32) {
    %c0_i32 = arith.constant 0 : i32
    %c0_i32_0 = arith.constant 0 : i32
    return %c0_i32, %arg0 : i32, i32
  }
  func.func @transform_3(%arg0: i32) -> (i32, i32) {
    %c0_i32 = arith.constant 0 : i32
    %c0_i32_0 = arith.constant 0 : i32
    return %c0_i32, %arg0 : i32, i32
  }
}

</mosaic_0001>

<bundles_post_ra>
// kernel: tpu_custom_call.1
= control target key start
LH: loop header
LB: loop body
LE: loop exit
PB: predicated region body
PF: predicated region fallthrough
CT: control target
= control target key end

     0   :  { %9 = vsyncpa [#allocation6], 0  ;;  %s174_s0 = inlined_call_operand.vmem [shape: f32[3], index: 0, kind: input, shape index: {}]   ;;  %s175_s1 = inlined_call_operand.<no memory space> [shape: f32[1], index: 1, kind: input, shape index: {}]   ;;  %s176_s2 = inlined_call_operand.hbm [shape: f32[3,8], index: 2, kind: input, shape index: {}]   ;;  %s177_s3 = inlined_call_operand.hbm [shape: f32[1,8], index: 3, kind: output, shape index: {}]  }
   0x1   :  { %10 = vsyncpa [#allocation4], 0 }
   0x2   :  { %11 = vsyncpa [#allocation5], 0  ;;  %s18_s14 = sshll.u32 %s174_s0, 4  ;;  %s19_s14 = int_to_ptr.vmem [resolvable:$true] %s18_s14 }
   0x3   :  { %s81_s15 = scalar_lea.vmem %s19_s14, 16  ;;  %p86_p1 = scmp.lt.s32.totalorder %s19_s14, %s19_s14 }
   0x4   :  { %p82_p0 = scmp.ne.s32.totalorder %s19_s14, %s81_s15  ;;  %p87_p2 = scmp.lt.s32.totalorder %s81_s15, %s81_s15 }
   0x6   :  { %p88_p3 = por %p87_p2, %p86_p1 }
   0x8   :  { %p89_p4 = pnand %p88_p3, %p82_p0 }
   0xa   :  { %92 = shalt.err (!%p89_p4)
}
   0xb   :  { %s139_s16 = smov [#allocation3]   ;;  %s140_s17 = smov [#allocation7]  }
   0xc   :  { %21 = dma.vmem_to_smem %s19_s14, 16, %s139_s16, [#allocation6]  }
   0xd   :  { %s30_s18 = sshll.u32 %s140_s17, 4  ;;  %s31_s18 = int_to_ptr.vmem [resolvable:$true] %s30_s18 }
   0xe   :  { %s101_s19 = scalar_lea.vmem %s31_s18, 64  ;;  %p106_p6 = scmp.lt.s32.totalorder %s31_s18, %s31_s18 }
   0xf   :  { %p102_p5 = scmp.ne.s32.totalorder %s31_s18, %s101_s19  ;;  %p107_p7 = scmp.lt.s32.totalorder %s101_s19, %s101_s19 }
  0x11   :  { %p108_p8 = por %p107_p7, %p106_p6 }
  0x13   :  { %p109_p9 = pnand %p108_p8, %p102_p5 }
  0x15   :  { %112 = shalt.err (!%p109_p9)
}
  0x16   :  { %33 = dma.hbm_to_vmem [thread:$0]  %s176_s2, 64, %s31_s18, [#allocation4]  }
  0x17   :  { %133 = dma.done.wait [#allocation6], 16  }
  0x18   :  { %134 = vsyncadd [#allocation6], 4294967280 }
  0x19   :  { %135 = dma.done.wait [#allocation4], 64  }
  0x1a   :  { %136 = vsyncadd [#allocation4], 4294967232 }
  0x1b   :  { %40 = sfence }
  0x1c   :  { %s42_s21 = sld [smem:[#allocation3]]  ;;  %v41_v0 = vld [vmem:[#allocation7] sm:$0x1]  ;;  %v45_v1 = vld [vmem:[#allocation7 + $0x1] sm:$0x1]  ;;  %v56_v10 = vstv %s175_s1  ;;  %s141_s25 = smov [#allocation8]  }
  0x1d   :  { %s76_s22 = sld [smem:[#allocation3 + $0x1]]  ;;  %v50_v3 = vld [vmem:[#allocation7 + $0x2] sm:$0x1]  ;;  %s66_s26 = sshll.u32 %s141_s25, 4  ;;  %vm58_vm0 = vcmask 57344   ;;  %s67_s26 = int_to_ptr.vmem [resolvable:$true] %s66_s26 }
  0x1e   :  { %s77_s23 = sld [smem:[#allocation3 + $0x2]]  ;;  %s113_s27 = scalar_lea.vmem %s67_s26, 16 }
  0x1f   :  { %p114_p10 = scmp.ne.s32.totalorder %s67_s26, %s113_s27  ;;  %s117_s28 = scalar_lea.vmem %s67_s26, 32 }
  0x20   :  { %p118_p11 = scmp.lt.s32.totalorder %s67_s26, %s67_s26  ;;  %p119_p12 = scmp.lt.s32.totalorder %s117_s28, %s113_s27 }
  0x22   :  { %v43_v2 = vstv %s42_s21  ;;  %p120_p13 = por %p119_p12, %p118_p11 }
  0x23   :  { %v44_v4 = vmul.f32 %v43_v2, %v41_v0  ;;  %v47_v5 = vstv %s76_s22 }
  0x24   :  { %v48_v6 = vmul.f32 %v47_v5, %v45_v1  ;;  %v52_v7 = vstv %s77_s23  ;;  %p121_p0 = pnand %p120_p13, %p114_p10 }
  0x25   :  { %v53_v8 = vmul.f32 %v52_v7, %v50_v3 }
  0x26   :  { %v49_v9 = vadd.f32 %v48_v6, %v44_v4 }
  0x28   :  { %v54_v11 = vadd.f32 %v53_v8, %v49_v9 }
  0x2a   :  { %v57_v12 = vadd.f32 %v56_v10, %v54_v11 }
  0x2c   :  { %59 = vst.msk [vmem:[#allocation8] sm:$0x1] %vm58_vm0, %v57_v12 }
  0x2d   :  { %124 = shalt.err (!%p121_p0)
}
  0x2e   :  { %69 = dma.vmem_to_hbm [thread:$0]  %s67_s26, 16, %s177_s3, [#allocation5]  }
  0x2f   :  { %137 = dma.done.wait [#allocation5], 16  }
  0x30   :  { %138 = vsyncadd [#allocation5], 4294967280 }
  0x31   :  { %73 = vsyncpa [#allocation4], 1 }
  0x32   :  { %74 = vsyncpa [#allocation5], 1 }
  0x33   :  { %75 = vsyncpa [#allocation6], 1 }

</bundles_post_ra>
